<compile_context>
chip_gen: v7x
topology: tpu7x:2x2x1
jax: 0.10.0
libtpu: 0.0.40
codegen_flags: <defaults>
</compile_context>

<pallas_src>
import jax
import jax.numpy as jnp
from jax import lax
from jax.experimental import pallas as pl
from jax.experimental.pallas import tpu as pltpu

LANE = 128


def _round_up(x, m):
    return ((x + m - 1) // m) * m


# ----------------------------- kernel helpers ------------------------------

def _one_hot(ids_2d, vocab_p):
    """ids_2d: (N, 1) int32 -> (N, vocab_p) f32 one-hot.

    Note: an out-of-range token id yields an all-zero row (gi = b_i) instead of
    failing like nn.Embedding; callers should keep ids in [0, vocab).
    """
    n = ids_2d.shape[0]
    iota = lax.broadcasted_iota(jnp.int32, (n, vocab_p), 1)
    return (iota == ids_2d).astype(jnp.float32)


def _gru_gates(gi, gh, h, b_hn, hp):
    """Lane-aligned GRU gate math (each gate occupies its own 128-lane slot).

    r  = sigmoid(gi_r + gh_r) ; z = sigmoid(gi_z + gh_z)
    n  = tanh(gi_n + r * (gh_n + b_hn))
    h' = (1 - z) * n + z * h
    (gi already contains b_ir+b_hr, b_iz+b_hz, b_in pre-summed.)
    """
    r = jax.nn.sigmoid(gi[:, :hp] + gh[:, :hp])
    z = jax.nn.sigmoid(gi[:, hp:2 * hp] + gh[:, hp:2 * hp])
    n = jnp.tanh(gi[:, 2 * hp:] + r * (gh[:, 2 * hp:] + b_hn))
    return (1.0 - z) * n + z * h


# ------------------------------ kernels ------------------------------------

def char_rnn_gru_step_kernel(
    ids_ref,                 # (B, 1) int32 token ids
    h_ref,                   # (B, Hp) previous hidden state (lane-padded)
    wei_ref,                 # (Vp, 3Hp)  emb @ [W_ir|pad|W_iz|pad|W_in|pad]
    wh_ref,                  # (Hp, 3Hp)  [W_hr|pad|W_hz|pad|W_hn|pad]
    bi_ref,                  # (1, 3Hp)   [b_ir+b_hr | b_iz+b_hz | b_in] lane-padded
    bhn_ref,                 # (1, Hp)    b_hn lane-padded
    wdec_ref,                # (Hp, Op)   decoder weight (padded)
    bdec_ref,                # (1, Op)    decoder bias (padded)
    out_ref,                 # (B, Op)    logits (lane-dense)
    hnew_ref,                # (B, Hp)    new hidden state
):
    hp = h_ref.shape[1]
    vp = wei_ref.shape[0]
    one_hot = _one_hot(ids_ref[...], vp)
    h = h_ref[...]
    gi = jnp.dot(one_hot, wei_ref[...], preferred_element_type=jnp.float32) + bi_ref[...]
    gh = jnp.dot(h, wh_ref[...], preferred_element_type=jnp.float32)
    h_new = _gru_gates(gi, gh, h, bhn_ref[...], hp)
    hnew_ref[...] = h_new.astype(hnew_ref.dtype)
    out_ref[...] = (
        jnp.dot(h_new, wdec_ref[...], preferred_element_type=jnp.float32)
        + bdec_ref[...]
    ).astype(out_ref.dtype)


def char_rnn_gru_seq_kernel(
    ids_ref,                 # (T*B, 1) int32 token ids for the whole sequence
    h0_ref,                  # (B, Hp)  initial hidden state
    wei_ref,                 # (Vp, 3Hp) resident
    wh_ref,                  # (Hp, 3Hp) resident
    bi_ref,                  # (1, 3Hp)  resident
    bhn_ref,                 # (1, Hp)   resident
    wdec_ref,                # (Hp, Op)  resident
    bdec_ref,                # (1, Op)   resident
    out_ref,                 # (T*B, Op) logits slab (lane-dense)
    hT_ref,                  # (B, Hp)   final hidden state
    gi_buf,                  # VMEM (T*B, 3Hp) precomputed input-side gates
    hs_buf,                  # VMEM (T*B, Hp)  per-step hidden states
):
    tb = ids_ref.shape[0]
    b = h0_ref.shape[0]
    t_steps = tb // b
    hp = h0_ref.shape[1]
    vp = wei_ref.shape[0]

    # ---- Phase 1 (off the serial chain): batched input-side matmul for ALL
    # tokens at once (M = T*B fills MXU sublanes, one-hot built once).
    one_hot = _one_hot(ids_ref[...], vp)
    gi_buf[...] = (
        jnp.dot(one_hot, wei_ref[...], preferred_element_type=jnp.float32)
        + bi_ref[...]
    )

    # ---- Phase 2: serial recurrence. Only h @ W_h + gate math per step; h is
    # a loop-carried value (one (B, Hp) vreg tile), no per-step HBM traffic.
    w_h = wh_ref[...]
    b_hn = bhn_ref[...]

    def step(t, h):
        off = pl.multiple_of(t * b, b)              # sublane-aligned offset
        gi = gi_buf[pl.ds(off, b), :]
        gh = jnp.dot(h, w_h, preferred_element_type=jnp.float32)
        h_new = _gru_gates(gi, gh, h, b_hn, hp)
        hs_buf[pl.ds(off, b), :] = h_new
        return h_new

    h_final = lax.fori_loop(0, t_steps, step, h0_ref[...], unroll=True)
    hT_ref[...] = h_final.astype(hT_ref.dtype)       # single final-hidden write

    # ---- Phase 3 (off the serial chain): one batched decoder matmul and a
    # single lane-dense store of the whole logits slab.
    out_ref[...] = (
        jnp.dot(hs_buf[...], wdec_ref[...], preferred_element_type=jnp.float32)
        + bdec_ref[...]
    ).astype(out_ref.dtype)


# ------------------------------ wrappers ------------------------------------

def pack_params(params):
    """One-time parameter packing/fusion (not part of the per-step hot path).

    Layout: each GRU gate gets its own 128-lane slot (lane offsets 0/Hp/2Hp),
    hidden/vocab/output dims are zero-padded to multiples of 128, and the
    embedding table is folded into the input weight (W_ei = emb @ W_i).
    """
    emb = params["embedding"]                                        # (V, H)
    V, H = emb.shape
    O = params["w_dec"].shape[1]
    Hp = _round_up(H, LANE)
    Vp = _round_up(V, LANE)
    Op = _round_up(O, LANE)

    def pad_cols(w):                                                 # (r, H)->(r, Hp)
        return jnp.pad(w, ((0, 0), (0, Hp - H)))

    def pad_h_gate(w):                                               # (H, H)->(Hp, Hp)
        return jnp.pad(w, ((0, Hp - H), (0, Hp - H)))

    # Input side, folded through the embedding: (V, 3Hp) -> pad rows to Vp.
    w_i = jnp.concatenate([pad_cols(params["w_ir"]),
                           pad_cols(params["w_iz"]),
                           pad_cols(params["w_in"])], axis=1)        # (H, 3Hp)
    w_ei = jnp.pad(emb @ w_i, ((0, Vp - V), (0, 0)))                 # (Vp, 3Hp)

    # Hidden side: rows padded to Hp (padded h lanes stay zero), gates lane-aligned.
    w_h = jnp.concatenate([pad_h_gate(params["w_hr"]),
                           pad_h_gate(params["w_hz"]),
                           pad_h_gate(params["w_hn"])], axis=1)      # (Hp, 3Hp)

    # Biases: r,z hidden biases pre-summed; b_hn kept separate (r * (gh_n + b_hn)).
    b_i = jnp.concatenate([pad_cols(params["b_ir"] + params["b_hr"]),
                           pad_cols(params["b_iz"] + params["b_hz"]),
                           pad_cols(params["b_in"])], axis=1)        # (1, 3Hp)
    b_hn = pad_cols(params["b_hn"])                                  # (1, Hp)

    w_dec = jnp.pad(params["w_dec"], ((0, Hp - H), (0, Op - O)))     # (Hp, Op)
    b_dec = jnp.pad(params["b_dec"], ((0, 0), (0, Op - O)))          # (1, Op)

    return {
        "w_ei": w_ei, "w_h": w_h, "b_i": b_i, "b_hn": b_hn,
        "w_dec": w_dec, "b_dec": b_dec,
        "vocab_size": int(V), "hidden_size": int(H), "output_size": int(O),
        "hidden_pad": int(Hp), "vocab_pad": int(Vp), "output_pad": int(Op),
    }


def char_rnn_forward(input_ids, hidden, packed):
    """Mirrors CharRNN.forward (one token per batch element).

    input_ids: (B,) int32 ; hidden: (1, B, H) f32
    returns (output (B, O), hidden (1, B, H))
    """
    B = input_ids.shape[0]
    H = packed["hidden_size"]
    O = packed["output_size"]
    Hp = packed["hidden_pad"]
    Op = packed["output_pad"]

    ids2 = input_ids.astype(jnp.int32).reshape(B, 1)
    h0 = jnp.pad(hidden[0], ((0, 0), (0, Hp - H)))

    vmem = pl.BlockSpec(memory_space=pltpu.MemorySpace.VMEM)
    out_p, h_new = pl.pallas_call(
        char_rnn_gru_step_kernel,
        out_shape=(
            jax.ShapeDtypeStruct((B, Op), jnp.float32),
            jax.ShapeDtypeStruct((B, Hp), jnp.float32),
        ),
        in_specs=[vmem] * 8,
        out_specs=(vmem, vmem),
    )(ids2, h0, packed["w_ei"], packed["w_h"], packed["b_i"], packed["b_hn"],
      packed["w_dec"], packed["b_dec"])

    return out_p[:, :O], h_new[:, :H][None, :, :]


def char_rnn_forward_sequence(input_ids, hidden, packed):
    """Runs the module forward over a whole sequence inside ONE pallas_call.

    Equivalent to calling CharRNN.forward T times. No grid: the batched
    input-side and decoder matmuls bracket an unrolled in-kernel recurrence
    that keeps the hidden state in registers.

    input_ids: (T, B) int32 ; hidden: (1, B, H) f32
    returns (outputs (T, B, O), hidden (1, B, H))
    """
    T, B = input_ids.shape
    H = packed["hidden_size"]
    O = packed["output_size"]
    Hp = packed["hidden_pad"]
    Op = packed["output_pad"]
    TB = T * B

    ids2 = input_ids.astype(jnp.int32).reshape(TB, 1)
    h0 = jnp.pad(hidden[0], ((0, 0), (0, Hp - H)))

    vmem = pl.BlockSpec(memory_space=pltpu.MemorySpace.VMEM)
    out_p, h_T = pl.pallas_call(
        char_rnn_gru_seq_kernel,
        out_shape=(
            jax.ShapeDtypeStruct((TB, Op), jnp.float32),
            jax.ShapeDtypeStruct((B, Hp), jnp.float32),
        ),
        in_specs=[vmem] * 8,
        out_specs=(vmem, vmem),
        scratch_shapes=[
            pltpu.VMEM((TB, 3 * Hp), jnp.float32),   # gi for all tokens
            pltpu.VMEM((TB, Hp), jnp.float32),       # hidden states for decoder
        ],
    )(ids2, h0, packed["w_ei"], packed["w_h"], packed["b_i"], packed["b_hn"],
      packed["w_dec"], packed["b_dec"])

    out = out_p.reshape(T, B, Op)[..., :O]
    return out, h_T[:, :H][None, :, :]


# ------------------------- params & pure-JAX reference ----------------------

def init_params(key, input_size, hidden_size, output_size):
    """Deterministic parameter init (PyTorch-style uniform(-1/sqrt(H), 1/sqrt(H)))."""
    H = hidden_size
    k = 1.0 / jnp.sqrt(jnp.float32(H))
    keys = jax.random.split(key, 16)

    def u(kk, shape):
        return jax.random.uniform(kk, shape, jnp.float32, -k, k)

    params = {
        "embedding": jax.random.normal(keys[0], (input_size, H), jnp.float32),
        "w_ir": u(keys[1], (H, H)), "w_iz": u(keys[2], (H, H)), "w_in": u(keys[3], (H, H)),
        "w_hr": u(keys[4], (H, H)), "w_hz": u(keys[5], (H, H)), "w_hn": u(keys[6], (H, H)),
        "b_ir": u(keys[7], (1, H)), "b_iz": u(keys[8], (1, H)), "b_in": u(keys[9], (1, H)),
        "b_hr": u(keys[10], (1, H)), "b_hz": u(keys[11], (1, H)), "b_hn": u(keys[12], (1, H)),
        "w_dec": u(keys[13], (H, output_size)),
        "b_dec": u(keys[14], (1, output_size)),
    }
    return params


def reference_forward(input_ids, hidden, params):
    """Pure-JAX reference of the same single-step forward pass."""
    x = params["embedding"][input_ids]
    h = hidden[0]
    r = jax.nn.sigmoid(x @ params["w_ir"] + params["b_ir"] + h @ params["w_hr"] + params["b_hr"])
    z = jax.nn.sigmoid(x @ params["w_iz"] + params["b_iz"] + h @ params["w_hz"] + params["b_hz"])
    n = jnp.tanh(x @ params["w_in"] + params["b_in"] + r * (h @ params["w_hn"] + params["b_hn"]))
    h_new = (1.0 - z) * n + z * h
    out = h_new @ params["w_dec"] + params["b_dec"]
    return out, h_new[None, :, :]


# ----------------------------------- main ------------------------------------

if __name__ == "__main__":
    input_size = 64      # vocab size
    hidden_size = 32
    output_size = 64
    batch = 8
    n_layers = 1
    seq_len = 16

    key = jax.random.PRNGKey(0)
    pkey, ikey, skey = jax.random.split(key, 3)
    params = init_params(pkey, input_size, hidden_size, output_size)
    packed = pack_params(params)

    # --- single-step forward (matches CharRNN.forward) ---
    input_ids = jax.random.randint(ikey, (batch,), 0, input_size, dtype=jnp.int32)
    hidden = jnp.zeros((n_layers, batch, hidden_size), jnp.float32)  # init_hidden()

    out, h_new = char_rnn_forward(input_ids, hidden, packed)
    out = jax.block_until_ready(out)
    h_new = jax.block_until_ready(h_new)

    ref_out, ref_h = reference_forward(input_ids, hidden, params)
    assert out.shape == (batch, output_size)
    assert h_new.shape == (n_layers, batch, hidden_size)
    assert jnp.allclose(out, ref_out, atol=1e-4, rtol=1e-4)
    assert jnp.allclose(h_new, ref_h, atol=1e-4, rtol=1e-4)

    # --- whole-sequence forward (single pallas_call, unrolled recurrence) ---
    seq_ids = jax.random.randint(skey, (seq_len, batch), 0, input_size, dtype=jnp.int32)
    seq_out, seq_h = char_rnn_forward_sequence(seq_ids, hidden, packed)
    seq_out = jax.block_until_ready(seq_out)
    seq_h = jax.block_until_ready(seq_h)

    ref_h_seq = hidden
    ref_outs = []
    for t in range(seq_len):
        o_t, ref_h_seq = reference_forward(seq_ids[t], ref_h_seq, params)
        ref_outs.append(o_t)
    ref_outs = jnp.stack(ref_outs, axis=0)

    assert seq_out.shape == (seq_len, batch, output_size)
    assert seq_h.shape == (n_layers, batch, hidden_size)
    assert jnp.allclose(seq_out, ref_outs, atol=1e-4, rtol=1e-4)
    assert jnp.allclose(seq_h, ref_h_seq, atol=1e-4, rtol=1e-4)

    print("KERNEL_OK")
</pallas_src>

<mosaic_0001>
module attributes {stable_mosaic.version = 11 : i64} {
  func.func @char_rnn_gru_step_kernel(%arg0: memref<8x1xi32, #tpu.memory_space<vmem>>, %arg1: memref<8x128xf32, #tpu.memory_space<vmem>>, %arg2: memref<128x384xf32, #tpu.memory_space<vmem>>, %arg3: memref<128x384xf32, #tpu.memory_space<vmem>>, %arg4: memref<1x384xf32, #tpu.memory_space<vmem>>, %arg5: memref<1x128xf32, #tpu.memory_space<vmem>>, %arg6: memref<128x128xf32, #tpu.memory_space<vmem>>, %arg7: memref<1x128xf32, #tpu.memory_space<vmem>>, %arg8: memref<8x128xf32, #tpu.memory_space<vmem>>, %arg9: memref<8x128xf32, #tpu.memory_space<vmem>>) attributes {dimension_semantics = [], scalar_prefetch = 0 : i64, scratch_operands = 0 : i64, tpu.core_type = #tpu.core_type<tc>} {
    %c0 = arith.constant 0 : index
    %c0_0 = arith.constant 0 : index
    %0 = vector.load %arg0[%c0, %c0_0] : memref<8x1xi32, #tpu.memory_space<vmem>>, vector<8x1xi32>
    %1 = tpu.iota {dimensions = array<i32: 1>} : vector<8x128xi32>
    %2 = vector.broadcast %0 : vector<8x1xi32> to vector<8x128xi32>
    %3 = arith.cmpi eq, %1, %2 : vector<8x128xi32>
    %4 = arith.extui %3 : vector<8x128xi1> to vector<8x128xi32>
    %5 = arith.sitofp %4 : vector<8x128xi32> to vector<8x128xf32>
    %c0_1 = arith.constant 0 : index
    %c0_2 = arith.constant 0 : index
    %6 = vector.load %arg1[%c0_1, %c0_2] : memref<8x128xf32, #tpu.memory_space<vmem>>, vector<8x128xf32>
    %c0_3 = arith.constant 0 : index
    %c0_4 = arith.constant 0 : index
    %7 = vector.load %arg2[%c0_3, %c0_4] : memref<128x384xf32, #tpu.memory_space<vmem>>, vector<128x384xf32>
    %cst = arith.constant dense<0.000000e+00> : vector<8x384xf32>
    %8 = tpu.matmul %5, %7, %cst {dimension_numbers = #tpu.dot_dimension_numbers<[1], [0], [0], [1], [0, 0, 1, 1], [], []>} : vector<8x128xf32>, vector<128x384xf32>, vector<8x384xf32> -> vector<8x384xf32>
    %c0_5 = arith.constant 0 : index
    %c0_6 = arith.constant 0 : index
    %9 = vector.load %arg4[%c0_5, %c0_6] : memref<1x384xf32, #tpu.memory_space<vmem>>, vector<1x384xf32>
    %10 = vector.broadcast %9 : vector<1x384xf32> to vector<8x384xf32>
    %11 = arith.addf %8, %10 : vector<8x384xf32>
    %c0_7 = arith.constant 0 : index
    %c0_8 = arith.constant 0 : index
    %12 = vector.load %arg3[%c0_7, %c0_8] : memref<128x384xf32, #tpu.memory_space<vmem>>, vector<128x384xf32>
    %cst_9 = arith.constant dense<0.000000e+00> : vector<8x384xf32>
    %13 = tpu.matmul %6, %12, %cst_9 {dimension_numbers = #tpu.dot_dimension_numbers<[1], [0], [0], [1], [0, 0, 1, 1], [], []>} : vector<8x128xf32>, vector<128x384xf32>, vector<8x384xf32> -> vector<8x384xf32>
    %c0_10 = arith.constant 0 : index
    %c0_11 = arith.constant 0 : index
    %14 = vector.load %arg5[%c0_10, %c0_11] : memref<1x128xf32, #tpu.memory_space<vmem>>, vector<1x128xf32>
    %15 = vector.extract_strided_slice %11 {offsets = [0, 0], sizes = [8, 128], strides = [1, 1]} : vector<8x384xf32> to vector<8x128xf32>
    %16 = vector.extract_strided_slice %13 {offsets = [0, 0], sizes = [8, 128], strides = [1, 1]} : vector<8x384xf32> to vector<8x128xf32>
    %17 = arith.addf %15, %16 : vector<8x128xf32>
    %18 = arith.negf %17 : vector<8x128xf32>
    %19 = math.exp %18 : vector<8x128xf32>
    %cst_12 = arith.constant 1.000000e+00 : f32
    %20 = vector.broadcast %cst_12 : f32 to vector<8x128xf32>
    %21 = arith.addf %20, %19 : vector<8x128xf32>
    %22 = arith.divf %20, %21 : vector<8x128xf32>
    %23 = vector.extract_strided_slice %11 {offsets = [0, 128], sizes = [8, 128], strides = [1, 1]} : vector<8x384xf32> to vector<8x128xf32>
    %24 = vector.extract_strided_slice %13 {offsets = [0, 128], sizes = [8, 128], strides = [1, 1]} : vector<8x384xf32> to vector<8x128xf32>
    %25 = arith.addf %23, %24 : vector<8x128xf32>
    %26 = arith.negf %25 : vector<8x128xf32>
    %27 = math.exp %26 : vector<8x128xf32>
    %cst_13 = arith.constant 1.000000e+00 : f32
    %28 = vector.broadcast %cst_13 : f32 to vector<8x128xf32>
    %29 = arith.addf %28, %27 : vector<8x128xf32>
    %30 = arith.divf %28, %29 : vector<8x128xf32>
    %31 = vector.extract_strided_slice %11 {offsets = [0, 256], sizes = [8, 128], strides = [1, 1]} : vector<8x384xf32> to vector<8x128xf32>
    %32 = vector.extract_strided_slice %13 {offsets = [0, 256], sizes = [8, 128], strides = [1, 1]} : vector<8x384xf32> to vector<8x128xf32>
    %33 = vector.broadcast %14 : vector<1x128xf32> to vector<8x128xf32>
    %34 = arith.addf %32, %33 : vector<8x128xf32>
    %35 = arith.mulf %22, %34 : vector<8x128xf32>
    %36 = arith.addf %31, %35 : vector<8x128xf32>
    %37 = math.tanh %36 : vector<8x128xf32>
    %cst_14 = arith.constant 1.000000e+00 : f32
    %38 = vector.broadcast %cst_14 : f32 to vector<8x128xf32>
    %39 = arith.subf %38, %30 : vector<8x128xf32>
    %40 = arith.mulf %39, %37 : vector<8x128xf32>
    %41 = arith.mulf %30, %6 : vector<8x128xf32>
    %42 = arith.addf %40, %41 : vector<8x128xf32>
    %c0_15 = arith.constant 0 : index
    %c0_16 = arith.constant 0 : index
    %43 = vector.load %arg9[%c0_15, %c0_16] : memref<8x128xf32, #tpu.memory_space<vmem>>, vector<8x128xf32>
    tpu.vector_store %arg9[%c0_15, %c0_16], %42 {strides = array<i32>} : memref<8x128xf32, #tpu.memory_space<vmem>>, vector<8x128xf32>,
    %c0_17 = arith.constant 0 : index
    %c0_18 = arith.constant 0 : index
    %44 = vector.load %arg6[%c0_17, %c0_18] : memref<128x128xf32, #tpu.memory_space<vmem>>, vector<128x128xf32>
    %cst_19 = arith.constant dense<0.000000e+00> : vector<8x128xf32>
    %45 = tpu.matmul %42, %44, %cst_19 {dimension_numbers = #tpu.dot_dimension_numbers<[1], [0], [0], [1], [0, 0, 1, 1], [], []>} : vector<8x128xf32>, vector<128x128xf32>, vector<8x128xf32> -> vector<8x128xf32>
    %c0_20 = arith.constant 0 : index
    %c0_21 = arith.constant 0 : index
    %46 = vector.load %arg7[%c0_20, %c0_21] : memref<1x128xf32, #tpu.memory_space<vmem>>, vector<1x128xf32>
    %47 = vector.broadcast %46 : vector<1x128xf32> to vector<8x128xf32>
    %48 = arith.addf %45, %47 : vector<8x128xf32>
    %c0_22 = arith.constant 0 : index
    %c0_23 = arith.constant 0 : index
    %49 = vector.load %arg8[%c0_22, %c0_23] : memref<8x128xf32, #tpu.memory_space<vmem>>, vector<8x128xf32>
    tpu.vector_store %arg8[%c0_22, %c0_23], %48 {strides = array<i32>} : memref<8x128xf32, #tpu.memory_space<vmem>>, vector<8x128xf32>,
    return
  }
}

</mosaic_0001>

<bundles_post_ra>
// kernel: tpu_custom_call.1
= control target key start
LH: loop header
LB: loop body
LE: loop exit
PB: predicated region body
PF: predicated region fallthrough
CT: control target
= control target key end

     0   :  { %15 = vsyncpa [#allocation3], 0  ;;  %s1264_s0 = inlined_call_operand.vmem [shape: s32[8,1], index: 0, kind: input, shape index: {}]   ;;  %s1265_s1 = inlined_call_operand.vmem [shape: f32[8,128], index: 1, kind: input, shape index: {}]   ;;  %s1266_s2 = inlined_call_operand.hbm [shape: f32[128,384], index: 2, kind: input, shape index: {}]   ;;  %s1267_s3 = inlined_call_operand.hbm [shape: f32[128,384], index: 3, kind: input, shape index: {}]   ;;  %s1268_s4 = inlined_call_operand.vmem [shape: f32[1,384], index: 4, kind: input, shape index: {}]   ;;  %s1269_s5 = inlined_call_operand.vmem [shape: f32[1,128], index: 5, kind: input, shape index: {}]   ;;  %s1270_s6 = inlined_call_operand.hbm [shape: f32[128,128], index: 6, kind: input, shape index: {}]   ;;  %s1271_s7 = inlined_call_operand.vmem [shape: f32[1,128], index: 7, kind: input, shape index: {}]   ;;  %s1272_s8 = inlined_call_operand.hbm [shape: f32[8,128], index: 8, kind: output, shape index: {0}]   ;;  %s1273_s9 = inlined_call_operand.hbm [shape: f32[8,128], index: 9, kind: output, shape index: {1}]  }
   0x1   :  { %16 = vsyncpa [#allocation6], 0 }
   0x2   :  { %17 = vsyncpa [#allocation4], 0 }
   0x3   :  { %18 = vsyncpa [#allocation10], 0  ;;  %s1079_s30 = smov [#allocation5]   ;;  %s1080_s11 = smov [#allocation2]  }
   0x4   :  { %s40_s10 = sshll.u32 %s1079_s30, 4  ;;  %s28_s12 = sshll.u32 %s1080_s11, 4  ;;  %s41_s10 = int_to_ptr.vmem [resolvable:$true] %s40_s10  ;;  %s1143_s12 = int_to_ptr.vmem [resolvable:$true] %s28_s12 }
   0x5   :  { %s961_s15 = scalar_lea.hbm %s1267_s3, 6144 }
   0x6   :  { %p962_p0 = scmp.ne.s32.totalorder %s1267_s3, %s961_s15  ;;  %p965_p1 = scmp.lt.u32.totalorder %s961_s15, %s1267_s3 }
   0x8   :  { %p967_p2 = pnand %p965_p1, %p962_p0 }
   0xa   :  { %970 = shalt.err (!%p967_p2)
}
   0xb   :  { %s971_s20 = scalar_lea.vmem %s41_s10, 6144  ;;  %p976_p4 = scmp.lt.s32.totalorder %s41_s10, %s41_s10 }
   0xc   :  { %p972_p3 = scmp.ne.s32.totalorder %s41_s10, %s971_s20  ;;  %p977_p5 = scmp.lt.s32.totalorder %s971_s20, %s971_s20 }
   0xe   :  { %p978_p6 = por %p977_p5, %p976_p4 }
  0x10   :  { %p979_p7 = pnand %p978_p6, %p972_p3 }
  0x12   :  { %982 = shalt.err (!%p979_p7)
}
  0x13   :  { %s1081_s21 = smov 384   ;;  %s1082_s22 = smov 24  }
  0x14   :  { %46 = dma.hbm_to_vmem [thread:$0]  %s1267_s3, 6144, %s41_s10, [#allocation6], %s1081_s21, %s1081_s21, %s1082_s22  }
  0x15   :  { %s983_s27 = scalar_lea.hbm %s1266_s2, 6144 }
  0x16   :  { %p984_p8 = scmp.ne.s32.totalorder %s1266_s2, %s983_s27  ;;  %p987_p9 = scmp.lt.u32.totalorder %s983_s27, %s1266_s2 }
  0x18   :  { %p989_p10 = pnand %p987_p9, %p984_p8 }
  0x1a   :  { %992 = shalt.err (!%p989_p10)
}
  0x1b   :  { %s993_s13 = scalar_lea.vmem %s1143_s12, 6144  ;;  %p998_p12 = scmp.lt.s32.totalorder %s1143_s12, %s1143_s12 }
  0x1c   :  { %p994_p11 = scmp.ne.s32.totalorder %s1143_s12, %s993_s13  ;;  %p999_p13 = scmp.lt.s32.totalorder %s993_s13, %s993_s13 }
  0x1e   :  { %p1000_p0 = por %p999_p13, %p998_p12 }
  0x20   :  { %p1001_p1 = pnand %p1000_p0, %p994_p11 }
  0x22   :  { %1004 = shalt.err (!%p1001_p1)
}
  0x23   :  { %34 = dma.hbm_to_vmem [thread:$0]  %s1266_s2, 6144, %s1143_s12, [#allocation3], %s1081_s21, %s1081_s21, %s1082_s22  }
  0x24   :  { %s1083_s14 = smov [#allocation7]   ;;  %s1005_s18 = scalar_lea.hbm %s1270_s6, 2048 }
  0x25   :  { %s56_s15 = sshll.u32 %s1083_s14, 4  ;;  %p1006_p2 = scmp.ne.s32.totalorder %s1270_s6, %s1005_s18  ;;  %s57_s15 = int_to_ptr.vmem [resolvable:$true] %s56_s15 }
  0x26   :  { %p1009_p3 = scmp.lt.u32.totalorder %s1005_s18, %s1270_s6 }
  0x28   :  { %p1011_p4 = pnand %p1009_p3, %p1006_p2 }
  0x2a   :  { %1014 = shalt.err (!%p1011_p4)
}
  0x2b   :  { %s1015_s25 = scalar_lea.vmem %s57_s15, 2048  ;;  %p1020_p6 = scmp.lt.s32.totalorder %s57_s15, %s57_s15 }
  0x2c   :  { %p1016_p5 = scmp.ne.s32.totalorder %s57_s15, %s1015_s25  ;;  %p1021_p7 = scmp.lt.s32.totalorder %s1015_s25, %s1015_s25 }
  0x2e   :  { %p1022_p8 = por %p1021_p7, %p1020_p6 }
  0x30   :  { %p1023_p9 = pnand %p1022_p8, %p1016_p5 }
  0x32   :  { %1026 = shalt.err (!%p1023_p9)
}
  0x33   :  { %s1084_s2 = smov 128   ;;  %s1085_s12 = smov 8  }
  0x34   :  { %62 = dma.hbm_to_vmem [thread:$0]  %s1270_s6, 2048, %s57_s15, [#allocation6], %s1084_s2, %s1084_s2, %s1085_s12  }
  0x35   :  { %1071 = dma.done.wait [#allocation3], 6144  }
  0x36   :  { %1072 = vsyncadd [#allocation3], 4294961152 }
  0x37   :  { %1073 = dma.done.wait [#allocation6], 8192  }
  0x38   :  { %1074 = vsyncadd [#allocation6], 4294959104  ;;  %v1086_v0 = vmov 0   ;;  %v1087_v1 = vmov 0.0|0.0   ;;  %v74_v2 = vld [vmem:[%s1264_s0] sm:$0xff]  ;;  %v85_v3 = vld [vmem:[#allocation2 + $0x8] sm:$0xff] }
  0x39   :  { %950 = vset.pattern.permute.xlu0 %v1086_v0  ;;  %828 = vmatprep.subr.bf16.mxu1 %v1087_v1  ;;  %v88_v4 = vld [vmem:[#allocation2 + $0x20] sm:$0xff]  ;;  %v87_v7 = vld [vmem:[#allocation2 + $0x18] sm:$0xff]  ;;  %v86_v8 = vld [vmem:[#allocation2 + $0x10] sm:$0xff]  ;;  %v1088_v9 = vmov 0.0   ;;  %vm1089_vm0 = vmmov 0   ;;  %s1091_s30 = smov [#allocation9]  }
  0x3a   :  { %78 = vperm.xlu0 %950, %v74_v2   ;;  %v796_v5 = vpack.c.bf16 %v88_v4, %v85_v3  ;;  %v84_v6 = vld [vmem:[#allocation2] sm:$0xff]  ;;  %213 = vmatprep.mubr.f32.mxu0 %v1088_v9  ;;  %v89_v11 = vld [vmem:[#allocation2 + $0x28] sm:$0xff]  ;;  %v91_v12 = vld [vmem:[#allocation2 + $0x38] sm:$0xff]  ;;  %s619_s11 = sshll.u32 %s1091_s30, 4  ;;  %s620_s11 = int_to_ptr.vmem [resolvable:$true] %s619_s11 }
  0x3b   :  { %v798_v10 = vpack.c.bf16 %v87_v7, %v84_v6  ;;  %v94_v13 = vld [vmem:[#allocation2 + $0x50] sm:$0xff]  ;;  %723 = vmatprep.mubr.msk.f32.mxu1 %vm1089_vm0, %v1088_v9  ;;  %v829_v14 = vpack.c.bf16 %v89_v11, %v86_v8  ;;  %v93_v17 = vld [vmem:[#allocation2 + $0x48] sm:$0xff]  ;;  %v92_v18 = vld [vmem:[#allocation2 + $0x40] sm:$0xff]  ;;  %p1032_p11 = scmp.lt.s32.totalorder %s620_s11, %s620_s11 }
  0x3c   :  { %797 = vmatprep.subr.bf16.mxu0 %v796_v5  ;;  %v800_v15 = vpack.c.bf16 %v94_v13, %v91_v12  ;;  %v90_v16 = vld [vmem:[#allocation2 + $0x30] sm:$0xff]  ;;  %v95_v20 = vld [vmem:[#allocation2 + $0x58] sm:$0xff]  ;;  %v97_v21 = vld [vmem:[#allocation2 + $0x68] sm:$0xff] }
  0x3d   :  { %799 = vmatpush1.bf16.msra.mxu0 %v798_v10  ;;  %v802_v19 = vpack.c.bf16 %v93_v17, %v90_v16  ;;  %v100_v22 = vld [vmem:[#allocation2 + $0x80] sm:$0xff]  ;;  %830 = vmatpush3.bf16.msra.mxu1 %v829_v14  ;;  %v832_v23 = vpack.c.bf16 %v95_v20, %v92_v18  ;;  %v99_v26 = vld [vmem:[#allocation2 + $0x78] sm:$0xff]  ;;  %v98_v27 = vld [vmem:[#allocation2 + $0x70] sm:$0xff]  ;;  %v75_v17 = vlaneseq }
  0x3e   :  { %801 = vmatprep.subr.bf16.mxu0 %v800_v15  ;;  %v804_v24 = vpack.c.bf16 %v100_v22, %v97_v21  ;;  %v96_v25 = vld [vmem:[#allocation2 + $0x60] sm:$0xff]  ;;  %831 = vmatprep.subr.bf16.mxu1 %v1087_v1  ;;  %v101_v28 = vld [vmem:[#allocation2 + $0x88] sm:$0xff]  ;;  %v103_v29 = vld [vmem:[#allocation2 + $0x98] sm:$0xff] }
  0x3f   :  { %v106_v30 = vld [vmem:[#allocation2 + $0xb0] sm:$0xff]  ;;  %v806_v31 = vpack.c.bf16 %v99_v26, %v96_v25  ;;  %v835_v32 = vpack.c.bf16 %v101_v28, %v98_v27  ;;  %v105_v35 = vld [vmem:[#allocation2 + $0xa8] sm:$0xff]  ;;  %v104_v36 = vld [vmem:[#allocation2 + $0xa0] sm:$0xff]  ;;  %v76_v22 = vand.u32 127, %v75_v17 }
  0x40   :  { %v808_v33 = vpack.c.bf16 %v106_v30, %v103_v29  ;;  %v102_v34 = vld [vmem:[#allocation2 + $0x90] sm:$0xff]  ;;  %v107_v37 = vld [vmem:[#allocation2 + $0xb8] sm:$0xff]  ;;  %v109_v38 = vld [vmem:[#allocation2 + $0xc8] sm:$0xff] }
  0x41   :  { %803 = vmatpush1.bf16.msra.mxu0 %v802_v19  ;;  %833 = vmatpush3.bf16.msra.mxu1 %v832_v23  ;;  %v112_v39 = vld [vmem:[#allocation2 + $0xe0] sm:$0xff]  ;;  %v810_v40 = vpack.c.bf16 %v105_v35, %v102_v34  ;;  %v838_v41 = vpack.c.bf16 %v107_v37, %v104_v36  ;;  %v111_v44 = vld [vmem:[#allocation2 + $0xd8] sm:$0xff]  ;;  %v110_v45 = vld [vmem:[#allocation2 + $0xd0] sm:$0xff]  ;;  %v1090_v35 = vmov 1.0  }
  0x42   :  { %805 = vmatprep.subr.bf16.mxu0 %v804_v24  ;;  %834 = vmatprep.subr.bf16.mxu1 %v1087_v1  ;;  %v812_v42 = vpack.c.bf16 %v112_v39, %v109_v38  ;;  %v108_v43 = vld [vmem:[#allocation2 + $0xc0] sm:$0xff]  ;;  %v113_v46 = vld [vmem:[#allocation2 + $0xe8] sm:$0xff]  ;;  %v115_v47 = vld [vmem:[#allocation2 + $0xf8] sm:$0xff] }
  0x43   :  { %v118_v48 = vld [vmem:[#allocation2 + $0x110] sm:$0xff]  ;;  %v814_v49 = vpack.c.bf16 %v111_v44, %v108_v43  ;;  %v841_v50 = vpack.c.bf16 %v113_v46, %v110_v45  ;;  %v117_v53 = vld [vmem:[#allocation2 + $0x108] sm:$0xff]  ;;  %v116_v54 = vld [vmem:[#allocation2 + $0x100] sm:$0xff] }
  0x44   :  { %v816_v51 = vpack.c.bf16 %v118_v48, %v115_v47  ;;  %v114_v52 = vld [vmem:[#allocation2 + $0xf0] sm:$0xff]  ;;  %v119_v55 = vld [vmem:[#allocation2 + $0x118] sm:$0xff]  ;;  %v121_v56 = vld [vmem:[#allocation2 + $0x128] sm:$0xff] }
  0x45   :  { %807 = vmatpush1.bf16.msra.mxu0 %v806_v31  ;;  %836 = vmatpush3.bf16.msra.mxu1 %v835_v32  ;;  %v124_v57 = vld [vmem:[#allocation2 + $0x140] sm:$0xff]  ;;  %v818_v58 = vpack.c.bf16 %v117_v53, %v114_v52  ;;  %v844_v59 = vpack.c.bf16 %v119_v55, %v116_v54  ;;  %v123_v62 = vld [vmem:[#allocation2 + $0x138] sm:$0xff]  ;;  %v122_v63 = vld [vmem:[#allocation2 + $0x130] sm:$0xff] }
  0x46   :  { %809 = vmatprep.subr.bf16.mxu0 %v808_v33  ;;  %837 = vmatprep.subr.bf16.mxu1 %v1087_v1  ;;  %v820_v60 = vpack.c.bf16 %v124_v57, %v121_v56  ;;  %v120_v61 = vld [vmem:[#allocation2 + $0x120] sm:$0xff]  ;;  %v125_v0 = vld [vmem:[#allocation2 + $0x148] sm:$0xff]  ;;  %v127_v2 = vld [vmem:[#allocation2 + $0x158] sm:$0xff] }
  0x47   :  { %v130_v3 = vld [vmem:[#allocation2 + $0x170] sm:$0xff]  ;;  %v822_v4 = vpack.c.bf16 %v123_v62, %v120_v61  ;;  %v847_v5 = vpack.c.bf16 %v125_v0, %v122_v63  ;;  %v129_v8 = vld [vmem:[#allocation2 + $0x168] sm:$0xff]  ;;  %v128_v10 = vld [vmem:[#allocation2 + $0x160] sm:$0xff] }
  0x48   :  { %v824_v6 = vpack.c.bf16 %v130_v3, %v127_v2  ;;  %v126_v7 = vld [vmem:[#allocation2 + $0x150] sm:$0xff]  ;;  %v131_v11 = vld [vmem:[#allocation2 + $0x178] sm:$0xff]  ;;  %v291_v12 = vld [vmem:[#allocation5 + $0x8] sm:$0xff] }
  0x49   :  { %811 = vmatpush1.bf16.msra.mxu0 %v810_v40  ;;  %839 = vmatpush3.bf16.msra.mxu1 %v838_v41  ;;  %v294_v13 = vld [vmem:[#allocation5 + $0x20] sm:$0xff]  ;;  %v826_v14 = vpack.c.bf16 %v129_v8, %v126_v7  ;;  %v850_v15 = vpack.c.bf16 %v131_v11, %v128_v10  ;;  %v293_v19 = vld [vmem:[#allocation5 + $0x18] sm:$0xff]  ;;  %v292_v20 = vld [vmem:[#allocation5 + $0x10] sm:$0xff] }
  0x4a   :  { %813 = vmatprep.subr.bf16.mxu0 %v812_v42  ;;  %840 = vmatprep.subr.bf16.mxu1 %v1087_v1  ;;  %v852_v16 = vpack.c.bf16 %v294_v13, %v291_v12  ;;  %v290_v18 = vld [vmem:[#allocation5] sm:$0xff]  ;;  %v295_v21 = vld [vmem:[#allocation5 + $0x28] sm:$0xff]  ;;  %v297_v23 = vld [vmem:[#allocation5 + $0x38] sm:$0xff] }
  0x4b   :  { %v300_v24 = vld [vmem:[#allocation5 + $0x50] sm:$0xff]  ;;  %v854_v25 = vpack.c.bf16 %v293_v19, %v290_v18  ;;  %v885_v27 = vpack.c.bf16 %v295_v21, %v292_v20  ;;  %v299_v30 = vld [vmem:[#allocation5 + $0x48] sm:$0xff]  ;;  %v298_v31 = vld [vmem:[#allocation5 + $0x40] sm:$0xff] }
  0x4c   :  { %v296_v26 = vld [vmem:[#allocation5 + $0x30] sm:$0xff]  ;;  %v856_v29 = vpack.c.bf16 %v300_v24, %v297_v23  ;;  %v301_v32 = vld [vmem:[#allocation5 + $0x58] sm:$0xff]  ;;  %v303_v33 = vld [vmem:[#allocation5 + $0x68] sm:$0xff] }
  0x4d   :  { %815 = vmatpush1.bf16.msra.mxu0 %v814_v49  ;;  %842 = vmatpush3.bf16.msra.mxu1 %v841_v50  ;;  %v306_v34 = vld [vmem:[#allocation5 + $0x80] sm:$0xff]  ;;  %v858_v36 = vpack.c.bf16 %v299_v30, %v296_v26  ;;  %v888_v38 = vpack.c.bf16 %v301_v32, %v298_v31  ;;  %v305_v40 = vld [vmem:[#allocation5 + $0x78] sm:$0xff]  ;;  %v304_v41 = vld [vmem:[#allocation5 + $0x70] sm:$0xff] }
  0x4e   :  { %817 = vmatprep.subr.bf16.mxu0 %v816_v51  ;;  %843 = vmatprep.subr.bf16.mxu1 %v1087_v1  ;;  %v302_v37 = vld [vmem:[#allocation5 + $0x60] sm:$0xff]  ;;  %v860_v39 = vpack.c.bf16 %v306_v34, %v303_v33  ;;  %v307_v42 = vld [vmem:[#allocation5 + $0x88] sm:$0xff]  ;;  %v309_v43 = vld [vmem:[#allocation5 + $0x98] sm:$0xff] }
  0x4f   :  { %v312_v44 = vld [vmem:[#allocation5 + $0xb0] sm:$0xff]  ;;  %v862_v45 = vpack.c.bf16 %v305_v40, %v302_v37  ;;  %v891_v47 = vpack.c.bf16 %v307_v42, %v304_v41  ;;  %v311_v49 = vld [vmem:[#allocation5 + $0xa8] sm:$0xff]  ;;  %v310_v50 = vld [vmem:[#allocation5 + $0xa0] sm:$0xff] }
  0x50   :  { %v308_v46 = vld [vmem:[#allocation5 + $0x90] sm:$0xff]  ;;  %v864_v48 = vpack.c.bf16 %v312_v44, %v309_v43  ;;  %v313_v51 = vld [vmem:[#allocation5 + $0xb8] sm:$0xff]  ;;  %v315_v52 = vld [vmem:[#allocation5 + $0xc8] sm:$0xff] }
  0x51   :  { %819 = vmatpush1.bf16.msra.mxu0 %v818_v58  ;;  %845 = vmatpush3.bf16.msra.mxu1 %v844_v59  ;;  %v318_v53 = vld [vmem:[#allocation5 + $0xe0] sm:$0xff]  ;;  %v866_v54 = vpack.c.bf16 %v311_v49, %v308_v46  ;;  %v894_v56 = vpack.c.bf16 %v313_v51, %v310_v50  ;;  %v317_v58 = vld [vmem:[#allocation5 + $0xd8] sm:$0xff]  ;;  %v316_v59 = vld [vmem:[#allocation5 + $0xd0] sm:$0xff] }
  0x52   :  { %821 = vmatprep.subr.bf16.mxu0 %v820_v60  ;;  %846 = vmatprep.subr.bf16.mxu1 %v1087_v1  ;;  %v314_v55 = vld [vmem:[#allocation5 + $0xc0] sm:$0xff]  ;;  %v868_v57 = vpack.c.bf16 %v318_v53, %v315_v52  ;;  %v319_v60 = vld [vmem:[#allocation5 + $0xe8] sm:$0xff]  ;;  %v321_v61 = vld [vmem:[#allocation5 + $0xf8] sm:$0xff]  ;;  %v135_v53 = vshrl.u32 %v75_v17, 7 }
  0x53   :  { %v324_v62 = vld [vmem:[#allocation5 + $0x110] sm:$0xff]  ;;  %v870_v63 = vpack.c.bf16 %v317_v58, %v314_v55  ;;  %v897_v2 = vpack.c.bf16 %v319_v60, %v316_v59  ;;  %v327_v7 = vld [vmem:[#allocation5 + $0x128] sm:$0xff]  ;;  %v330_v8 = vld [vmem:[#allocation5 + $0x140] sm:$0xff] }
  0x54   :  { %v320_v0 = vld [vmem:[#allocation5 + $0xf0] sm:$0xff]  ;;  %v872_v3 = vpack.c.bf16 %v324_v62, %v321_v61  ;;  %v326_v11 = vld [vmem:[#allocation5 + $0x120] sm:$0xff]  ;;  %v876_v13 = vpack.c.bf16 %v330_v8, %v327_v7  ;;  %v333_v18 = vld [vmem:[#allocation5 + $0x158] sm:$0xff]  ;;  %v136_v60 = vsub.s32 0, %v135_v53  ;;  %v140_v61 = vsub.s32 1, %v135_v53 }
  0x55   :  { %823 = vmatpush1.bf16.msra.mxu0 %v822_v4  ;;  %848 = vmatpush3.bf16.msra.mxu1 %v847_v5  ;;  %v323_v4 = vld [vmem:[#allocation5 + $0x108] sm:$0xff]  ;;  %v322_v5 = vld [vmem:[#allocation5 + $0x100] sm:$0xff]  ;;  %v336_v19 = vld [vmem:[#allocation5 + $0x170] sm:$0xff] }
  0x56   :  { %825 = vmatprep.subr.bf16.mxu0 %v824_v6  ;;  %849 = vmatprep.subr.bf16.mxu1 %v1087_v1  ;;  %v325_v6 = vld [vmem:[#allocation5 + $0x118] sm:$0xff]  ;;  %v874_v10 = vpack.c.bf16 %v323_v4, %v320_v0  ;;  %v332_v21 = vld [vmem:[#allocation5 + $0x150] sm:$0xff]  ;;  %v880_v23 = vpack.c.bf16 %v336_v19, %v333_v18  ;;  %v335_v24 = vld [vmem:[#allocation5 + $0x168] sm:$0xff] }
  0x57   :  { %v900_v12 = vpack.c.bf16 %v325_v6, %v322_v5  ;;  %v337_v26 = vld [vmem:[#allocation5 + $0x178] sm:$0xff]  ;;  %v509_v30 = vld [vmem:[#allocation7] sm:$0xff]  ;;  %v510_v31 = vld [vmem:[#allocation7 + $0x8] sm:$0xff] }
  0x58   :  { %v909_v32 = vpack.c.bf16 %v510_v31, %v509_v30  ;;  %v511_v33 = vld [vmem:[#allocation7 + $0x10] sm:$0xff]  ;;  %v512_v34 = vld [vmem:[#allocation7 + $0x18] sm:$0xff]  ;;  %v514_v37 = vld [vmem:[#allocation7 + $0x28] sm:$0xff] }
  0x59   :  { %827 = vmatpush1.bf16.msra.mxu0 %v826_v14  ;;  %851 = vmatpush3.bf16.msra.mxu1 %v850_v15  ;;  %v329_v14 = vld [vmem:[#allocation5 + $0x138] sm:$0xff]  ;;  %v328_v15 = vld [vmem:[#allocation5 + $0x130] sm:$0xff]  ;;  %v517_v41 = vld [vmem:[#allocation7 + $0x40] sm:$0xff] }
  0x5a   :  { %853 = vmatprep.subr.bf16.mxu0 %v852_v16  ;;  %884 = vmatprep.subr.bf16.mxu1 %v1087_v1  ;;  %v331_v16 = vld [vmem:[#allocation5 + $0x148] sm:$0xff]  ;;  %v878_v20 = vpack.c.bf16 %v329_v14, %v326_v11  ;;  %v519_v44 = vld [vmem:[#allocation7 + $0x50] sm:$0xff]  ;;  %v524_v51 = vld [vmem:[#allocation7 + $0x78] sm:$0xff] }
  0x5b   :  { %v518_v42 = vld [vmem:[#allocation7 + $0x48] sm:$0xff]  ;;  %v523_v50 = vld [vmem:[#allocation7 + $0x70] sm:$0xff]  ;;  %v132_v55 = vld [vmem:[%s1268_s4] sm:$0x7] }
  0x5c   :  { %v921_v43 = vpack.c.bf16 %v518_v42, %v517_v41  ;;  %v930_v52 = vpack.c.bf16 %v524_v51, %v523_v50  ;;  %v137_v62 = vrot.slane %v132_v55, %v136_v60  ;;  %v638_v11 = vld [vmem:[%s1269_s5] ss:$0 sm:$0xff]  ;;  %s1027_s5 = scalar_lea.vmem %s620_s11, 128 }
  0x5d   :  { %p1028_p10 = scmp.ne.s32.totalorder %s620_s11, %s1027_s5  ;;  %p1033_p12 = scmp.lt.s32.totalorder %s1027_s5, %s1027_s5 }
  0x5f   :  { %p1034_p13 = por %p1033_p12, %p1032_p11 }
  0x61   :  { %p1035_p0 = pnand %p1034_p13, %p1028_p10 }
  0xb9   :  { %v79_v28 = vpop.permute.xlu0 %78 }
  0xba   :  { %vm80_vm1 = vcmp.eq.s32.totalorder %v76_v22, %v79_v28  ;;  %v903_v22 = vpack.c.bf16 %v331_v16, %v328_v15 }
  0xbb   :  { %634 = vmatmul.mubr.msk.f32.vlgmr.msra.gmra.mrb[0].mxu0 %vm80_vm1, %v1090_v35  ;;  %724 = vmatmul.mubr.msk.f32.vlgmr.msra.gmra.mrb[0].mxu1 %vm80_vm1, %v1090_v35  ;;  %v912_v35 = vpack.c.bf16 %v512_v34, %v511_v33 }
  0xbc   :  { %855 = vmatpush1.bf16.msra.mxu0 %v854_v25  ;;  %886 = vmatpush3.bf16.msra.mxu1 %v885_v27  ;;  %v334_v25 = vld [vmem:[#allocation5 + $0x160] sm:$0xff]  ;;  %v882_v27 = vpack.c.bf16 %v335_v24, %v332_v21 }
  0xbd   :  { %857 = vmatprep.subr.bf16.mxu0 %v856_v29  ;;  %887 = vmatprep.subr.bf16.mxu1 %v1087_v1  ;;  %v906_v28 = vpack.c.bf16 %v337_v26, %v334_v25  ;;  %v1215_v29 = vld [vmem:[%s1265_s1] sm:$0xff] }
  0xbe   :  { %402 = vmatprep.mubr.f32.mxu0 %v1088_v9  ;;  %758 = vmatprep.mubr.msk.f32.mxu1 %vm1089_vm0, %v1088_v9 }
  0xc0   :  { %859 = vmatpush1.bf16.msra.mxu0 %v858_v36  ;;  %889 = vmatpush3.bf16.msra.mxu1 %v888_v38  ;;  %v513_v36 = vld [vmem:[#allocation7 + $0x20] sm:$0xff] }
  0xc1   :  { %861 = vmatprep.subr.bf16.mxu0 %v860_v39  ;;  %890 = vmatprep.subr.bf16.mxu1 %v1087_v1  ;;  %v915_v38 = vpack.c.bf16 %v514_v37, %v513_v36  ;;  %v515_v39 = vld [vmem:[#allocation7 + $0x30] sm:$0xff] }
  0xc4   :  { %863 = vmatpush1.bf16.msra.mxu0 %v862_v45  ;;  %892 = vmatpush3.bf16.msra.mxu1 %v891_v47  ;;  %v520_v45 = vld [vmem:[#allocation7 + $0x58] sm:$0xff]  ;;  %v521_v47 = vld [vmem:[#allocation7 + $0x60] sm:$0xff] }
  0xc5   :  { %865 = vmatprep.subr.bf16.mxu0 %v864_v48  ;;  %893 = vmatprep.subr.bf16.mxu1 %v1087_v1  ;;  %v924_v46 = vpack.c.bf16 %v520_v45, %v519_v44  ;;  %v522_v48 = vld [vmem:[#allocation7 + $0x68] sm:$0xff] }
  0xc6   :  { %v927_v49 = vpack.c.bf16 %v522_v48, %v521_v47 }
  0xc8   :  { %867 = vmatpush1.bf16.msra.mxu0 %v866_v54  ;;  %895 = vmatpush3.bf16.msra.mxu1 %v894_v56  ;;  %v144_v54 = vsub.s32 2, %v135_v53 }
  0xc9   :  { %869 = vmatprep.subr.bf16.mxu0 %v868_v57  ;;  %896 = vmatprep.subr.bf16.mxu1 %v1087_v1 }
  0xca   :  { %v145_v56 = vrot.slane %v132_v55, %v144_v54 }
  0xcc   :  { %871 = vmatpush1.bf16.msra.mxu0 %v870_v63  ;;  %898 = vmatpush3.bf16.msra.mxu1 %v897_v2  ;;  %v141_v63 = vrot.slane %v132_v55, %v140_v61 }
  0xcd   :  { %873 = vmatprep.subr.bf16.mxu0 %v872_v3  ;;  %899 = vmatprep.subr.bf16.mxu1 %v1087_v1 }
  0xd0   :  { %875 = vmatpush1.bf16.msra.mxu0 %v874_v10  ;;  %901 = vmatpush3.bf16.msra.mxu1 %v900_v12 }
  0xd1   :  { %877 = vmatprep.subr.bf16.mxu0 %v876_v13  ;;  %902 = vmatprep.subr.bf16.mxu1 %v1087_v1 }
  0xd4   :  { %879 = vmatpush1.bf16.msra.mxu0 %v878_v20  ;;  %904 = vmatpush3.bf16.msra.mxu1 %v903_v22 }
  0xd5   :  { %881 = vmatprep.subr.bf16.mxu0 %v880_v23  ;;  %905 = vmatprep.subr.bf16.mxu1 %v1087_v1 }
  0xd8   :  { %883 = vmatpush1.bf16.msra.mxu0 %v882_v27  ;;  %907 = vmatpush3.bf16.msra.mxu1 %v906_v28 }
  0xd9   :  { %908 = vmatprep.subr.bf16.mxu0 %v1087_v1 }
  0xdb   :  { %403 = vmatmul.mubr.f32.vlgmr.msra.gmra.mrb[0].mxu0 %v1215_v29  ;;  %759 = vmatmul.mubr.f32.vlgmr.msra.gmra.mrb[2].mxu1 %v1215_v29 }
  0xdc   :  { %793 = vmatprep.mubr.msk.f32.mxu0 %vm1089_vm0, %v1088_v9  ;;  %910 = vmatpush3.bf16.msra.mxu0 %v909_v32  ;;  %v516_v9 = vld [vmem:[#allocation7 + $0x38] sm:$0xff] }
  0xdd   :  { %911 = vmatprep.subr.bf16.mxu0 %v1087_v1  ;;  %v918_v40 = vpack.c.bf16 %v516_v9, %v515_v39 }
  0xe0   :  { %913 = vmatpush3.bf16.msra.mxu0 %v912_v35 }
  0xe1   :  { %914 = vmatprep.subr.bf16.mxu0 %v1087_v1 }
  0xe4   :  { %916 = vmatpush3.bf16.msra.mxu0 %v915_v38 }
  0xe5   :  { %917 = vmatprep.subr.bf16.mxu0 %v1087_v1 }
  0xe8   :  { %919 = vmatpush3.bf16.msra.mxu0 %v918_v40 }
  0xe9   :  { %920 = vmatprep.subr.bf16.mxu0 %v1087_v1 }
  0xec   :  { %922 = vmatpush3.bf16.msra.mxu0 %v921_v43 }
  0xed   :  { %923 = vmatprep.subr.bf16.mxu0 %v1087_v1 }
  0xf0   :  { %925 = vmatpush3.bf16.msra.mxu0 %v924_v46 }
  0xf1   :  { %926 = vmatprep.subr.bf16.mxu0 %v1087_v1 }
  0xf4   :  { %928 = vmatpush3.bf16.msra.mxu0 %v927_v49 }
  0xf5   :  { %929 = vmatprep.subr.bf16.mxu0 %v1087_v1 }
  0xf8   :  { %931 = vmatpush3.bf16.msra.mxu0 %v930_v52 }
 0x18e   :  { %v286_v57 = vpop.f32.mrb[0].mxu1 }
 0x18f   :  { %v287_v58 = vadd.f32 %v286_v57, %v145_v56  ;;  %v725_v59 = vpop.f32.mrb[1].mxu1 }
 0x1ae   :  { %v404_v0 = vpop.f32.mrb[0].mxu0  ;;  %v475_v2 = vpop.f32.mrb[2].mxu1 }
 0x1af   :  { %v932_v3 = vadd.f32 %v404_v0, %v137_v62  ;;  %v406_v1 = vpop.f32.mrb[1].mxu0  ;;  %v760_v4 = vpop.f32.mrb[3].mxu1  ;;  %v500_v13 = vadd.f32 %v638_v11, %v475_v2 }
 0x1b0   :  { %v933_v5 = vadd.f32 %v406_v1, %v141_v63 }
 0x1b1   :  { %v636_v17 = vmul.f32 -1.442695, %v932_v3 }
 0x1b2   :  { %v637_v6 = vmul.f32 -1.442695, %v933_v5 }
 0x1b3   :  { %951 = vpow2.f32 %v636_v17 }
 0x1b4   :  { %953 = vpow2.f32 %v637_v6 }
 0x1bd   :  { %v952_v7 = vpop.eup %951 }
 0x1be   :  { %v484_v8 = vadd.f32 1.0, %v952_v7  ;;  %v954_v10 = vpop.eup %953 }
 0x1bf   :  { %v491_v12 = vadd.f32 1.0, %v954_v10 }
 0x1c0   :  { %955 = vrcp.f32 %v484_v8 }
 0x1c1   :  { %957 = vrcp.f32 %v491_v12 }
 0x1ca   :  { %v956_v14 = vpop.eup %955 }
 0x1cb   :  { %v501_v15 = vmul.f32 %v956_v14, %v500_v13  ;;  %v958_v18 = vpop.eup %957 }
 0x1cc   :  { %v504_v19 = vsub.f32 1.0, %v958_v18  ;;  %v506_v22 = vmul.f32 %v958_v18, %v1215_v29 }
 0x1cd   :  { %v502_v16 = vadd.f32 %v501_v15, %v287_v58 }
 0x1cf   :  { %959 = vtanh.f32 %v502_v16 }
 0x1d9   :  { %v960_v20 = vpop.eup %959 }
 0x1da   :  { %v505_v21 = vmul.f32 %v960_v20, %v504_v19 }
 0x1dc   :  { %v507_v23 = vadd.f32 %v506_v22, %v505_v21 }
 0x1de   :  { %794 = vmatmul.mubr.f32.vlgmr.msra.gmra.mrb[2].mxu0 %v507_v23  ;;  %508 = vst [vmem:[#allocation9] sm:$0xff] %v507_v23 }
 0x1df   :  { %1038 = shalt.err (!%p1035_p0)
}
 0x1e0   :  { %s1039_s10 = scalar_lea.hbm %s1273_s9, 128 }
 0x1e1   :  { %p1040_p1 = scmp.ne.s32.totalorder %s1273_s9, %s1039_s10  ;;  %p1043_p2 = scmp.lt.u32.totalorder %s1039_s10, %s1273_s9 }
 0x1e3   :  { %p1045_p3 = pnand %p1043_p2, %p1040_p1 }
 0x1e5   :  { %1048 = shalt.err (!%p1045_p3)
}
 0x1e6   :  { %622 = dma.vmem_to_hbm [thread:$0]  %s620_s11, 128, %s1273_s9, [#allocation10]   ;;  %v639_v24 = vld [vmem:[%s1271_s7] ss:$0 sm:$0xff] }
 0x1e7   :  { %s1092_s24 = smov [#allocation8]  }
 0x1e8   :  { %s609_s25 = sshll.u32 %s1092_s24, 4  ;;  %s610_s25 = int_to_ptr.vmem [resolvable:$true] %s609_s25 }
 0x1e9   :  { %s1049_s2 = scalar_lea.vmem %s610_s25, 128  ;;  %p1054_p5 = scmp.lt.s32.totalorder %s610_s25, %s610_s25 }
 0x1ea   :  { %p1050_p4 = scmp.ne.s32.totalorder %s610_s25, %s1049_s2  ;;  %p1055_p6 = scmp.lt.s32.totalorder %s1049_s2, %s1049_s2 }
 0x1ec   :  { %p1056_p7 = por %p1055_p6, %p1054_p5 }
 0x1ee   :  { %p1057_p8 = pnand %p1056_p7, %p1050_p4 }
 0x2b1   :  { %v598_v25 = vpop.f32.mrb[2].mxu0 }
 0x2b2   :  { %v599_v26 = vadd.f32 %v639_v24, %v598_v25  ;;  %v795_v27 = vpop.f32.mrb[3].mxu0 }
 0x2b4   :  { %602 = vst [vmem:[#allocation8] sm:$0xff] %v599_v26 }
 0x2b5   :  { %1060 = shalt.err (!%p1057_p8)
}
 0x2b6   :  { %s1061_s21 = scalar_lea.hbm %s1272_s8, 128 }
 0x2b7   :  { %p1062_p9 = scmp.ne.s32.totalorder %s1272_s8, %s1061_s21  ;;  %p1065_p10 = scmp.lt.u32.totalorder %s1061_s21, %s1272_s8 }
 0x2b9   :  { %p1067_p11 = pnand %p1065_p10, %p1062_p9 }
 0x2bb   :  { %1070 = shalt.err (!%p1067_p11)
}
 0x2bc   :  { %612 = dma.vmem_to_hbm [thread:$0]  %s610_s25, 128, %s1272_s8, [#allocation4]  }
 0x2bd   :  { %1075 = dma.done.wait [#allocation4], 128  }
 0x2be   :  { %1076 = vsyncadd [#allocation4], 4294967168 }
 0x2bf   :  { %1077 = dma.done.wait [#allocation10], 128  }
 0x2c0   :  { %1078 = vsyncadd [#allocation10], 4294967168 }
 0x2c1   :  { %629 = vsyncpa [#allocation3], 1 }
 0x2c2   :  { %630 = vsyncpa [#allocation6], 1 }
 0x2c3   :  { %631 = vsyncpa [#allocation4], 1 }
 0x2c4   :  { %632 = vsyncpa [#allocation10], 1 }

</bundles_post_ra>
